<compile_context>
chip_gen: v6e
topology: v6e:2x2x1
jax: 0.10.0
libtpu: 0.0.40
codegen_flags: <defaults>
</compile_context>

<pallas_src>
import functools

import jax
import jax.numpy as jnp
from jax.experimental import pallas as pl
from jax.experimental.pallas import tpu as pltpu


def _madkd_mlp_kernel(ys_ref, yt_ref, w1_ref, b1_ref, w2_ref, b2_ref,
                      s_ref, t_ref):
    """s = (y_s @ W1 + b1) @ W2 + b2 ; t = (y_t @ W1 + b1) @ W2 + b2."""
    w1 = w1_ref[...]            # (in, hid)
    b1 = b1_ref[...]            # (1, hid)
    w2 = w2_ref[...]            # (hid, out)
    b2 = b2_ref[...]            # (1, out)

    def mlp(x):
        h = jnp.dot(x, w1, preferred_element_type=jnp.float32) + b1
        o = jnp.dot(h.astype(w2.dtype), w2,
                    preferred_element_type=jnp.float32) + b2
        return o

    s_ref[...] = mlp(ys_ref[...]).astype(s_ref.dtype)
    t_ref[...] = mlp(yt_ref[...]).astype(t_ref.dtype)


def madkd_mlp_pallas(y_s, y_t, w1t, b1, w2t, b2):
    """Single launch: both inputs, both linear layers, two outputs."""
    B, in_dim = y_s.shape
    hid = w1t.shape[1]
    out_dim = w2t.shape[1]
    b1_2d = b1.reshape(1, hid)
    b2_2d = b2.reshape(1, out_dim)

    itemsize = jnp.dtype(y_s.dtype).itemsize
    cost = pl.CostEstimate(
        flops=2 * (2 * B) * in_dim * hid + 2 * (2 * B) * hid * out_dim,
        transcendentals=0,
        bytes_accessed=(y_s.size + y_t.size + w1t.size + b1_2d.size
                        + w2t.size + b2_2d.size + 2 * B * out_dim) * itemsize,
    )

    # Grid-less: every operand is a single full-array VMEM block (block ==
    # full array, so the (8,128) rule is trivially satisfied).
    vmem_spec = lambda: pl.BlockSpec(memory_space=pltpu.MemorySpace.VMEM)
    s_out, t_out = pl.pallas_call(
        _madkd_mlp_kernel,
        out_shape=(jax.ShapeDtypeStruct((B, out_dim), y_s.dtype),
                   jax.ShapeDtypeStruct((B, out_dim), y_t.dtype)),
        in_specs=[vmem_spec() for _ in range(6)],
        out_specs=(vmem_spec(), vmem_spec()),
        cost_estimate=cost,
    )(y_s, y_t, w1t, b1_2d, w2t, b2_2d)
    return s_out, t_out


# Gradient reversal: identity in the forward pass; gradient scaled by -lambda_
# in the backward pass (matches GradientReversalFunction).
@functools.partial(jax.custom_vjp, nondiff_argnums=(1,))
def grad_reverse(x, lambda_):
    return x


def _grl_fwd(x, lambda_):
    return x, None


def _grl_bwd(lambda_, _, g):
    return (-lambda_ * g,)


grad_reverse.defvjp(_grl_fwd, _grl_bwd)


def xavier_uniform(key, fan_in, fan_out, dtype=jnp.float32):
    bound = jnp.sqrt(6.0 / (fan_in + fan_out))
    # torch stores Linear weight as (fan_out, fan_in); we keep the transposed
    # (fan_in, fan_out) layout so the kernel does plain x @ W.
    return jax.random.uniform(
        key, (fan_in, fan_out), dtype=dtype, minval=-bound, maxval=bound
    )


def madkd_forward(y_s, y_t, lambda_, labels, params):
    """Reproduces MadKD.forward: (y_s_model, y_t_model, y_s_mlp_rev, y_t_mlp_rev)."""
    w1t, b1, w2t, b2 = params

    # One kernel launch covers everything: both mlp layers for both inputs.
    s_out, t_out = madkd_mlp_pallas(y_s, y_t, w1t, b1, w2t, b2)

    y_s_model = s_out
    y_t_model = jax.lax.stop_gradient(t_out)          # torch: under no_grad
    y_s_mlp_rev = grad_reverse(s_out, lambda_)
    y_t_mlp_rev = jax.lax.stop_gradient(t_out)        # torch: under no_grad
    # TODO(synk): backward routing of the torch module (frozen mlp params on
    # the y_s_model branch vs. detached y_s + reversed grad into the params on
    # the y_s_mlp_rev branch) is not modeled: the Pallas kernel is
    # forward-only and both branches share one launch. Forward values match.
    # labels is unused in the torch forward as well.
    return y_s_model, y_t_model, y_s_mlp_rev, y_t_mlp_rev


if __name__ == "__main__":
    # Small shapes consistent with the module (Linear(in, hid) -> Linear(hid, out)).
    batch = 8
    input_size = 32
    hidden_size = 64
    output_size = 32

    key = jax.random.PRNGKey(0)
    k1, k2, k3, k4 = jax.random.split(key, 4)

    # Deterministic parameter init (xavier_uniform weights, zero biases),
    # mirroring MadKD.weight_init.
    w1t = xavier_uniform(k1, input_size, hidden_size)
    b1 = jnp.zeros((hidden_size,), jnp.float32)
    w2t = xavier_uniform(k2, hidden_size, output_size)
    b2 = jnp.zeros((output_size,), jnp.float32)
    params = (w1t, b1, w2t, b2)

    y_s = jax.random.normal(k3, (batch, input_size), jnp.float32)
    y_t = jax.random.normal(k4, (batch, input_size), jnp.float32)
    lambda_ = 0.5
    labels = jnp.zeros((batch,), jnp.int32)  # unused by forward

    outs = jax.block_until_ready(madkd_forward(y_s, y_t, lambda_, labels, params))

    # Sanity check against a pure-JAX reference of the unfused math.
    def ref_mlp(x):
        return (x @ w1t + b1) @ w2t + b2

    ref = (ref_mlp(y_s), ref_mlp(y_t), ref_mlp(y_s), ref_mlp(y_t))
    for o, r in zip(outs, ref):
        assert o.shape == (batch, output_size)
        assert jnp.allclose(o, r, atol=1e-5, rtol=1e-5), float(jnp.max(jnp.abs(o - r)))

    print("KERNEL_OK")
</pallas_src>

<mosaic_0001>
module attributes {stable_mosaic.version = 11 : i64} {
  func.func @_madkd_mlp_kernel(%arg0: memref<8x32xf32, #tpu.memory_space<vmem>>, %arg1: memref<8x32xf32, #tpu.memory_space<vmem>>, %arg2: memref<32x64xf32, #tpu.memory_space<vmem>>, %arg3: memref<1x64xf32, #tpu.memory_space<vmem>>, %arg4: memref<64x32xf32, #tpu.memory_space<vmem>>, %arg5: memref<1x32xf32, #tpu.memory_space<vmem>>, %arg6: memref<8x32xf32, #tpu.memory_space<vmem>>, %arg7: memref<8x32xf32, #tpu.memory_space<vmem>>) attributes {dimension_semantics = [], scalar_prefetch = 0 : i64, scratch_operands = 0 : i64, tpu.core_type = #tpu.core_type<tc>} {
    %c0 = arith.constant 0 : index
    %c0_0 = arith.constant 0 : index
    %0 = vector.load %arg2[%c0, %c0_0] : memref<32x64xf32, #tpu.memory_space<vmem>>, vector<32x64xf32>
    %c0_1 = arith.constant 0 : index
    %c0_2 = arith.constant 0 : index
    %1 = vector.load %arg3[%c0_1, %c0_2] : memref<1x64xf32, #tpu.memory_space<vmem>>, vector<1x64xf32>
    %c0_3 = arith.constant 0 : index
    %c0_4 = arith.constant 0 : index
    %2 = vector.load %arg4[%c0_3, %c0_4] : memref<64x32xf32, #tpu.memory_space<vmem>>, vector<64x32xf32>
    %c0_5 = arith.constant 0 : index
    %c0_6 = arith.constant 0 : index
    %3 = vector.load %arg5[%c0_5, %c0_6] : memref<1x32xf32, #tpu.memory_space<vmem>>, vector<1x32xf32>
    %c0_7 = arith.constant 0 : index
    %c0_8 = arith.constant 0 : index
    %4 = vector.load %arg0[%c0_7, %c0_8] : memref<8x32xf32, #tpu.memory_space<vmem>>, vector<8x32xf32>
    %cst = arith.constant dense<0.000000e+00> : vector<8x64xf32>
    %5 = tpu.matmul %4, %0, %cst {dimension_numbers = #tpu.dot_dimension_numbers<[1], [0], [0], [1], [0, 0, 1, 1], [], []>} : vector<8x32xf32>, vector<32x64xf32>, vector<8x64xf32> -> vector<8x64xf32>
    %6 = vector.broadcast %1 : vector<1x64xf32> to vector<8x64xf32>
    %7 = arith.addf %5, %6 : vector<8x64xf32>
    %cst_9 = arith.constant dense<0.000000e+00> : vector<8x32xf32>
    %8 = tpu.matmul %7, %2, %cst_9 {dimension_numbers = #tpu.dot_dimension_numbers<[1], [0], [0], [1], [0, 0, 1, 1], [], []>} : vector<8x64xf32>, vector<64x32xf32>, vector<8x32xf32> -> vector<8x32xf32>
    %9 = vector.broadcast %3 : vector<1x32xf32> to vector<8x32xf32>
    %10 = arith.addf %8, %9 : vector<8x32xf32>
    %c0_10 = arith.constant 0 : index
    %c0_11 = arith.constant 0 : index
    %11 = vector.load %arg6[%c0_10, %c0_11] : memref<8x32xf32, #tpu.memory_space<vmem>>, vector<8x32xf32>
    tpu.vector_store %arg6[%c0_10, %c0_11], %10 {strides = array<i32>} : memref<8x32xf32, #tpu.memory_space<vmem>>, vector<8x32xf32>,
    %c0_12 = arith.constant 0 : index
    %c0_13 = arith.constant 0 : index
    %12 = vector.load %arg1[%c0_12, %c0_13] : memref<8x32xf32, #tpu.memory_space<vmem>>, vector<8x32xf32>
    %cst_14 = arith.constant dense<0.000000e+00> : vector<8x64xf32>
    %13 = tpu.matmul %12, %0, %cst_14 {dimension_numbers = #tpu.dot_dimension_numbers<[1], [0], [0], [1], [0, 0, 1, 1], [], []>} : vector<8x32xf32>, vector<32x64xf32>, vector<8x64xf32> -> vector<8x64xf32>
    %14 = vector.broadcast %1 : vector<1x64xf32> to vector<8x64xf32>
    %15 = arith.addf %13, %14 : vector<8x64xf32>
    %cst_15 = arith.constant dense<0.000000e+00> : vector<8x32xf32>
    %16 = tpu.matmul %15, %2, %cst_15 {dimension_numbers = #tpu.dot_dimension_numbers<[1], [0], [0], [1], [0, 0, 1, 1], [], []>} : vector<8x64xf32>, vector<64x32xf32>, vector<8x32xf32> -> vector<8x32xf32>
    %17 = vector.broadcast %3 : vector<1x32xf32> to vector<8x32xf32>
    %18 = arith.addf %16, %17 : vector<8x32xf32>
    %c0_16 = arith.constant 0 : index
    %c0_17 = arith.constant 0 : index
    %19 = vector.load %arg7[%c0_16, %c0_17] : memref<8x32xf32, #tpu.memory_space<vmem>>, vector<8x32xf32>
    tpu.vector_store %arg7[%c0_16, %c0_17], %18 {strides = array<i32>} : memref<8x32xf32, #tpu.memory_space<vmem>>, vector<8x32xf32>,
    return
  }
}

</mosaic_0001>

<bundles_post_ra>
// kernel: tpu_custom_call.1
= control target key start
LH: loop header
LB: loop body
LE: loop exit
PB: predicated region body
PF: predicated region fallthrough
CT: control target
= control target key end

     0   :  { %13 = vsyncpa [#allocation3], 0  ;;  %v521_v1 = vmov 0.0   ;;  %s655_s0 = inlined_call_operand.vmem [shape: f32[8,32], index: 0, kind: input, shape index: {}]   ;;  %s656_s1 = inlined_call_operand.vmem [shape: f32[8,32], index: 1, kind: input, shape index: {}]   ;;  %s657_s2 = inlined_call_operand.vmem [shape: f32[32,64], index: 2, kind: input, shape index: {}]   ;;  %s658_s3 = inlined_call_operand.vmem [shape: f32[1,64], index: 3, kind: input, shape index: {}]   ;;  %s659_s4 = inlined_call_operand.vmem [shape: f32[64,32], index: 4, kind: input, shape index: {}]   ;;  %s660_s5 = inlined_call_operand.vmem [shape: f32[1,32], index: 5, kind: input, shape index: {}]   ;;  %s661_s6 = inlined_call_operand.hbm [shape: f32[8,32], index: 6, kind: output, shape index: {0}]   ;;  %s662_s7 = inlined_call_operand.hbm [shape: f32[8,32], index: 7, kind: output, shape index: {1}]  }
   0x1   :  { %v30_v0 = vld [vmem:[%s657_s2 + $0x18] sm:$0xff]  ;;  %413 = vmatprep.subr.mxu1 %v521_v1  ;;  %443 = vmatprep.subr.mxu0 %v521_v1  ;;  %v29_v2 = vld [vmem:[%s657_s2 + $0x10] sm:$0xff]  ;;  %v28_v3 = vld [vmem:[%s657_s2 + $0x8] sm:$0xff] }
   0x2   :  { %414 = vmatpush3.msra.mxu1 %v30_v0  ;;  %444 = vmatpush3.msra.mxu0 %v30_v0 }
   0x3   :  { %415 = vmatprep.subr.mxu1 %v521_v1  ;;  %445 = vmatprep.subr.mxu0 %v521_v1 }
   0x4   :  { %416 = vmatpush3.msra.mxu1 %v29_v2  ;;  %446 = vmatpush3.msra.mxu0 %v29_v2 }
   0x5   :  { %14 = vsyncpa [#allocation5], 0  ;;  %417 = vmatprep.subr.mxu1 %v521_v1  ;;  %447 = vmatprep.subr.mxu0 %v521_v1  ;;  %v27_v4 = vld [vmem:[%s657_s2] sm:$0xff]  ;;  %vm48_vm0 = vcmask 261120   ;;  %vm522_vm1 = vmmov 0   ;;  %v39_v7 = vld [vmem:[%s659_s4 + $0x38] sm:$0xff] }
   0x6   :  { %418 = vmatpush3.msra.mxu1 %v28_v3  ;;  %448 = vmatpush3.msra.mxu0 %v28_v3  ;;  %v41_v5 = vld [vmem:[%s655_s0] sm:$0xff]  ;;  %v38_v8 = vld [vmem:[%s659_s4 + $0x30] sm:$0xff]  ;;  %v37_v9 = vld [vmem:[%s659_s4 + $0x28] sm:$0xff]  ;;  %vm128_vm2 = vcmask 523264   ;;  %s524_s8 = smov [#allocation4]  }
   0x7   :  { %419 = vmatprep.subr.mxu1 %v521_v1  ;;  %449 = vmatprep.subr.mxu0 %v521_v1  ;;  %v203_v6 = vld [vmem:[%s656_s1] sm:$0xff]  ;;  %v35_v11 = vld [vmem:[%s659_s4 + $0x18] sm:$0xff]  ;;  %v34_v12 = vld [vmem:[%s659_s4 + $0x10] sm:$0xff]  ;;  %s367_s9 = sshll.u32 %s524_s8, 4  ;;  %s368_s9 = int_to_ptr.vmem [resolvable:$true] %s367_s9 }
   0x8   :  { %420 = vmatpush3.msra.mxu1 %v27_v4  ;;  %421 = vmatprep.mubr.msk.f32.mxu1 %vm522_vm1, %v521_v1  ;;  %v36_v10 = vld [vmem:[%s659_s4 + $0x20] sm:$0xff]  ;;  %v33_v13 = vld [vmem:[%s659_s4 + $0x8] sm:$0xff] }
   0x9   :  { %450 = vmatpush3.msra.mxu0 %v27_v4  ;;  %451 = vmatprep.mubr.msk.f32.mxu0 %vm522_vm1, %v521_v1  ;;  %v32_v14 = vld [vmem:[%s659_s4] sm:$0xff]  ;;  %s523_s4 = smov [#allocation2]  }
   0xa   :  { %422 = vmatmul.mubr.msk.f32.vlgmr.msra.gmra.mxu1 %vm48_vm0, %v41_v5  ;;  %452 = vmatmul.mubr.msk.f32.vlgmr.msra.gmra.mxu0 %vm48_vm0, %v203_v6  ;;  %v379_v15 = vld [vmem:[%s658_s3] ss:$0 sm:$0xff]  ;;  %s357_s30 = sshll.u32 %s523_s4, 4  ;;  %s358_s30 = int_to_ptr.vmem [resolvable:$true] %s357_s30 }
   0xb   :  { %424 = vmatprep.subr.mxu1 %v521_v1  ;;  %454 = vmatprep.subr.mxu0 %v521_v1  ;;  %v381_v22 = vld [vmem:[%s660_s5] ss:$0 sm:$0xff]  ;;  %s477_s3 = scalar_lea.vmem %s358_s30, 128  ;;  %p482_p1 = scmp.lt.s32.totalorder %s358_s30, %s358_s30 }
   0xc   :  { %425 = vmatpush3.msra.mxu1 %v39_v7  ;;  %455 = vmatpush3.msra.mxu0 %v39_v7  ;;  %p478_p0 = scmp.ne.s32.totalorder %s358_s30, %s477_s3  ;;  %p483_p2 = scmp.lt.s32.totalorder %s477_s3, %s477_s3 }
   0xd   :  { %426 = vmatprep.subr.mxu1 %v521_v1  ;;  %456 = vmatprep.subr.mxu0 %v521_v1 }
   0xe   :  { %427 = vmatpush3.msra.mxu1 %v38_v8  ;;  %457 = vmatpush3.msra.mxu0 %v38_v8  ;;  %p484_p3 = por %p483_p2, %p482_p1 }
   0xf   :  { %428 = vmatprep.subr.mxu1 %v521_v1  ;;  %458 = vmatprep.subr.mxu0 %v521_v1 }
  0x10   :  { %429 = vmatpush3.msra.mxu1 %v37_v9  ;;  %459 = vmatpush3.msra.mxu0 %v37_v9  ;;  %p485_p4 = pnand %p484_p3, %p478_p0 }
  0x11   :  { %430 = vmatprep.subr.mxu1 %v521_v1  ;;  %460 = vmatprep.subr.mxu0 %v521_v1 }
  0x12   :  { %431 = vmatpush3.msra.mxu1 %v36_v10  ;;  %461 = vmatpush3.msra.mxu0 %v36_v10 }
  0x13   :  { %432 = vmatprep.subr.mxu1 %v521_v1  ;;  %462 = vmatprep.subr.mxu0 %v521_v1 }
  0x14   :  { %433 = vmatpush3.msra.mxu1 %v35_v11  ;;  %463 = vmatpush3.msra.mxu0 %v35_v11 }
  0x15   :  { %434 = vmatprep.subr.mxu1 %v521_v1  ;;  %464 = vmatprep.subr.mxu0 %v521_v1 }
  0x16   :  { %435 = vmatpush3.msra.mxu1 %v34_v12  ;;  %465 = vmatpush3.msra.mxu0 %v34_v12 }
  0x17   :  { %436 = vmatprep.subr.mxu1 %v521_v1  ;;  %466 = vmatprep.subr.mxu0 %v521_v1 }
  0x18   :  { %440 = vmatprep.mubr.msk.f32.mxu1 %vm522_vm1, %v521_v1  ;;  %470 = vmatprep.mubr.msk.f32.mxu0 %vm522_vm1, %v521_v1 }
  0x19   :  { %437 = vmatpush3.msra.mxu1 %v33_v13  ;;  %467 = vmatpush3.msra.mxu0 %v33_v13 }
  0x1a   :  { %438 = vmatprep.subr.mxu1 %v521_v1  ;;  %468 = vmatprep.subr.mxu0 %v521_v1 }
  0x1b   :  { %439 = vmatpush3.msra.mxu1 %v32_v14  ;;  %469 = vmatpush3.msra.mxu0 %v32_v14 }
  0xca   :  { %v118_v16 = vpop.f32.mrf.mxu1  ;;  %v273_v17 = vpop.f32.mrf.mxu0 }
  0xcb   :  { %v119_v18 = vadd.f32 %v379_v15, %v118_v16  ;;  %v274_v19 = vadd.f32 %v379_v15, %v273_v17 }
  0xcc   :  { %v423_v20 = vpop.f32.mrf.mxu1  ;;  %v453_v21 = vpop.f32.mrf.mxu0 }
  0xcd   :  { %441 = vmatmul.mubr.msk.f32.vlgmr.msra.gmra.mxu1 %vm128_vm2, %v119_v18  ;;  %471 = vmatmul.mubr.msk.f32.vlgmr.msra.gmra.mxu0 %vm128_vm2, %v274_v19 }
 0x18d   :  { %v198_v23 = vpop.f32.mrf.mxu1  ;;  %v346_v24 = vpop.f32.mrf.mxu0 }
 0x18e   :  { %v199_v25 = vadd.f32 %v381_v22, %v198_v23  ;;  %v347_v26 = vadd.f32 %v381_v22, %v346_v24 }
 0x18f   :  { %v442_v27 = vpop.f32.mrf.mxu1  ;;  %v472_v28 = vpop.f32.mrf.mxu0 }
 0x190   :  { %202 = vst.msk [vmem:[#allocation2] sm:$0xff] %vm48_vm0, %v199_v25  ;;  %350 = vst.msk [vmem:[#allocation4] sm:$0xff] %vm48_vm0, %v347_v26 }
 0x191   :  { %488 = shalt.err (!%p485_p4)
}
 0x192   :  { %360 = dma.vmem_to_hbm [thread:$0]  %s358_s30, 128, %s661_s6, [#allocation3]  }
 0x193   :  { %s497_s11 = scalar_lea.vmem %s368_s9, 128  ;;  %p502_p6 = scmp.lt.s32.totalorder %s368_s9, %s368_s9 }
 0x194   :  { %p498_p5 = scmp.ne.s32.totalorder %s368_s9, %s497_s11  ;;  %p503_p7 = scmp.lt.s32.totalorder %s497_s11, %s497_s11 }
 0x196   :  { %p504_p8 = por %p503_p7, %p502_p6 }
 0x198   :  { %p505_p9 = pnand %p504_p8, %p498_p5 }
 0x19a   :  { %508 = shalt.err (!%p505_p9)
}
 0x19b   :  { %370 = dma.vmem_to_hbm [thread:$0]  %s368_s9, 128, %s662_s7, [#allocation5]  }
 0x19c   :  { %517 = dma.done.wait [#allocation3], 128  }
 0x19d   :  { %518 = vsyncadd [#allocation3], 4294967168 }
 0x19e   :  { %519 = dma.done.wait [#allocation5], 128  }
 0x19f   :  { %520 = vsyncadd [#allocation5], 4294967168 }
 0x1a0   :  { %377 = vsyncpa [#allocation3], 1 }
 0x1a1   :  { %378 = vsyncpa [#allocation5], 1 }

</bundles_post_ra>
